<compile_context>
chip_gen: v7x
topology: tpu7x:2x2x1
jax: 0.10.0
libtpu: 0.0.40
codegen_flags: <defaults>
</compile_context>

<pallas_src>
import functools

import jax
import jax.numpy as jnp
from jax.experimental import pallas as pl
from jax.experimental.pallas import tpu as pltpu

EPS = 1e-5
_VMEM_LIMIT = 32 * 1024 * 1024  # raise v5e's 16 MiB scoped default; fits v6e/v7x too


# --------------------------------------------------------------------------- helpers
def _pick_flat_tile(total, cap):
    """Largest multiple of 8 dividing `total`, <= cap (fallback: total)."""
    best, d = total, 8
    while d <= min(cap, total):
        if total % d == 0:
            best = d
        d += 8
    return best


def _pick_row_tile(m, wo, cap):
    """Largest tile = tr*wo (whole image rows, tr % 8 == 0) dividing m, <= cap."""
    best, tr = m, 8
    while tr * wo <= min(cap, m):
        if m % (tr * wo) == 0:
            best = tr * wo
        tr += 8
    return best


def _affine_from_sums(sums, count, gamma, beta):
    """(sum, sum_sq) per channel -> BN scale/shift (one-pass biased variance)."""
    mean = sums[0] / count
    var = sums[1] / count - mean * mean
    scale = gamma.reshape(-1) * jax.lax.rsqrt(var + EPS)
    shift = beta.reshape(-1) - mean * scale
    return jnp.stack([scale, shift]).astype(jnp.float32)            # (2, C)


# ------------------------------------------------------- pass 1: BN1 channel stats
def _stats_kernel(x_ref, o_ref):
    xv = x_ref[...].astype(jnp.float32)
    s = jnp.sum(xv, axis=0, keepdims=True)
    ss = jnp.sum(xv * xv, axis=0, keepdims=True)
    o_ref[...] = jnp.concatenate([s, ss], axis=0)[None]


def _channel_sums(x2d, tile_rows):
    m, c = x2d.shape
    grid = m // tile_rows
    part = pl.pallas_call(
        _stats_kernel,
        out_shape=jax.ShapeDtypeStruct((grid, 2, c), jnp.float32),
        grid=(grid,),
        in_specs=[pl.BlockSpec((tile_rows, c), lambda i: (i, 0))],
        out_specs=pl.BlockSpec((1, 2, c), lambda i: (i, 0, 0)),
        compiler_params=pltpu.CompilerParams(
            dimension_semantics=("parallel",), vmem_limit_bytes=_VMEM_LIMIT),
    )(x2d)
    return jnp.sum(part, axis=0)                                     # tiny (2, c) reduce


# --------------------------- pass 2: BN1+ReLU -> conv1 (1x1) + shortcut + BN2 stats
def _stage1_kernel(x_ref, aff1_ref, w1_ref, b1_ref, wsc_ref, bsc_ref,
                   c1_ref, sc_ref, st2_ref, *, tile_r, wo, cout):
    xv = x_ref[...].astype(jnp.float32)                              # (TM, Cin)
    # BN1 with precomputed scale/shift (only the kept rows are normalized) + ReLU
    a1 = jnp.maximum(xv * aff1_ref[0:1, :] + aff1_ref[1:2, :], 0.0)
    # 1x1 conv Cin -> Cb on the MXU (bf16 operands, f32 accumulate)
    c1 = jnp.dot(a1.astype(jnp.bfloat16), w1_ref[...],
                 preferred_element_type=jnp.float32) + b1_ref[...]
    c1_ref[...] = c1
    # fused partial BN2 statistics for this tile (reduced across tiles outside)
    st2_ref[...] = jnp.concatenate(
        [jnp.sum(c1, axis=0, keepdims=True),
         jnp.sum(c1 * c1, axis=0, keepdims=True)], axis=0)[None]
    # shortcut 1x1 conv Cin -> Cout; stored lane-dense as (rows, Wo*Cout)
    sc = jnp.dot(xv.astype(jnp.bfloat16), wsc_ref[...],
                 preferred_element_type=jnp.float32) + bsc_ref[...]
    sc_ref[...] = sc.reshape(tile_r, wo * cout)


# ------------------------------ pass 3: BN2+ReLU -> 3x3 conv (im2col) + BN3 stats
def _stage2_kernel(c1_ref, aff2_ref, w2_ref, b2_ref, c2_ref, st3_ref, pad_ref,
                   *, ho, wo, cb):
    # BN2 + ReLU directly in the (Ho, Wo*Cb) layout (aff2 pre-tiled to Wo*Cb lanes)
    a2 = jnp.maximum(c1_ref[0] * aff2_ref[0:1, :] + aff2_ref[1:2, :], 0.0)
    # zero padding lives in a VMEM scratch (no jnp.concatenate / jnp.pad copies)
    pad_ref[...] = jnp.zeros_like(pad_ref)
    pad_ref[1:ho + 1, cb:(wo + 1) * cb] = a2
    # im2col: nine shifted slabs -> one (Ho*Wo, 9*Cb) patch matrix -> ONE MXU matmul
    taps = [pad_ref[dy:dy + ho, dx * cb:dx * cb + wo * cb].reshape(ho * wo, cb)
            for dy in range(3) for dx in range(3)]
    patches = jnp.concatenate(taps, axis=-1).astype(jnp.bfloat16)    # (Ho*Wo, 9*Cb)
    c2 = jnp.dot(patches, w2_ref[...],
                 preferred_element_type=jnp.float32) + b2_ref[...]
    c2_ref[...] = c2[None]
    st3_ref[...] = jnp.concatenate(
        [jnp.sum(c2, axis=0, keepdims=True),
         jnp.sum(c2 * c2, axis=0, keepdims=True)], axis=0)[None]


# ------------------------------------ pass 4: BN3+ReLU -> conv3 (1x1) + shortcut add
def _stage3_kernel(c2_ref, aff3_ref, w3_ref, b3_ref, sc_ref, o_ref,
                   *, tile_r, wo, cout):
    a3 = jnp.maximum(c2_ref[...] * aff3_ref[0:1, :] + aff3_ref[1:2, :], 0.0)
    c3 = jnp.dot(a3.astype(jnp.bfloat16), w3_ref[...],
                 preferred_element_type=jnp.float32) + b3_ref[...]
    # lane-dense output store: (rows, Wo*Cout) instead of (rows*Wo, Cout)
    o_ref[...] = c3.reshape(tile_r, wo * cout) + sc_ref[...]


# ----------------------------------------------------------------------- wrapper
def pre_act_residual_unit_nhwc(x, params, stride=1, tile_m_cap=512):
    """NHWC-native forward.  x: (N, H, W, Cin) f32 -> (N, Ho, Wo, Cout) f32.
    `tile_m_cap` caps the flattened-row tile; size it to the target generation's
    VMEM (v7x: 64 MiB physical / 32 MiB scoped; v5e/v6e: 128 MiB physical)."""
    N, H, W, Cin = x.shape
    Cb = params["w1"].shape[1]
    Cout = params["w3"].shape[1]
    assert H % stride == 0 and W % stride == 0
    Ho, Wo = H // stride, W // stride
    assert Wo % 8 == 0, "kernel assumes the (sub-sampled) width is a multiple of 8"
    M0, M, R = N * H * W, N * Ho * Wo, N * Ho

    x = x.astype(jnp.float32)
    x_flat = x.reshape(M0, Cin)

    # weights cast once to bf16 (MXU-native on v5e/v6e/v7x); BN affine pairs packed (2, C)
    w1 = params["w1"].astype(jnp.bfloat16)
    w2 = params["w2"].reshape(9 * Cb, Cb).astype(jnp.bfloat16)       # rows = (dy, dx, cin)
    w3 = params["w3"].astype(jnp.bfloat16)
    wsc = params["wsc"].astype(jnp.bfloat16)
    b1 = params["b1"].reshape(1, Cb).astype(jnp.float32)
    b2 = params["b2"].reshape(1, Cb).astype(jnp.float32)
    b3 = params["b3"].reshape(1, Cout).astype(jnp.float32)
    bsc = params["bsc"].reshape(1, Cout).astype(jnp.float32)

    # ---- pass 1: BN1 statistics over the full input (tiled reduction) ----
    aff1 = _affine_from_sums(_channel_sums(x_flat, _pick_flat_tile(M0, tile_m_cap)),
                             M0, params["g1"], params["be1"])

    # ---- stride: subsample once in the wrapper (only kept rows get normalized) ----
    # TODO(synk): fold the stride-2 subsample into pass-2's BlockSpec index_map
    # (pl.Element offsets) to avoid this extra XLA strided-slice pass.
    xs_flat = x_flat if stride == 1 else x[:, ::stride, ::stride, :].reshape(M, Cin)

    tile_m = _pick_row_tile(M, Wo, tile_m_cap)
    tile_r = tile_m // Wo
    g = M // tile_m
    cparams = pltpu.CompilerParams(dimension_semantics=("parallel",),
                                   vmem_limit_bytes=_VMEM_LIMIT)

    # ---- pass 2 ----
    c1_flat, sc_rows, st2 = pl.pallas_call(
        functools.partial(_stage1_kernel, tile_r=tile_r, wo=Wo, cout=Cout),
        out_shape=(jax.ShapeDtypeStruct((M, Cb), jnp.float32),
                   jax.ShapeDtypeStruct((R, Wo * Cout), jnp.float32),
                   jax.ShapeDtypeStruct((g, 2, Cb), jnp.float32)),
        grid=(g,),
        in_specs=[pl.BlockSpec((tile_m, Cin), lambda i: (i, 0)),
                  pl.BlockSpec((2, Cin), lambda i: (0, 0)),
                  pl.BlockSpec((Cin, Cb), lambda i: (0, 0)),
                  pl.BlockSpec((1, Cb), lambda i: (0, 0)),
                  pl.BlockSpec((Cin, Cout), lambda i: (0, 0)),
                  pl.BlockSpec((1, Cout), lambda i: (0, 0))],
        out_specs=(pl.BlockSpec((tile_m, Cb), lambda i: (i, 0)),
                   pl.BlockSpec((tile_r, Wo * Cout), lambda i: (i, 0)),
                   pl.BlockSpec((1, 2, Cb), lambda i: (i, 0, 0))),
        compiler_params=cparams,
    )(xs_flat, aff1, w1, b1, wsc, bsc)
    aff2 = _affine_from_sums(jnp.sum(st2, axis=0), M, params["g2"], params["be2"])

    # ---- pass 3 (tiled over batch so the 3x3 halo stays inside one block) ----
    # TODO(synk): for very large feature maps tile pass 3 over row blocks with a 1-row halo.
    c1_rows = c1_flat.reshape(N, Ho, Wo * Cb)                        # free reshape
    aff2w = jnp.tile(aff2, (1, Wo))                                  # (2, Wo*Cb)
    c2_img, st3 = pl.pallas_call(
        functools.partial(_stage2_kernel, ho=Ho, wo=Wo, cb=Cb),
        out_shape=(jax.ShapeDtypeStruct((N, Ho * Wo, Cb), jnp.float32),
                   jax.ShapeDtypeStruct((N, 2, Cb), jnp.float32)),
        grid=(N,),
        in_specs=[pl.BlockSpec((1, Ho, Wo * Cb), lambda n: (n, 0, 0)),
                  pl.BlockSpec((2, Wo * Cb), lambda n: (0, 0)),
                  pl.BlockSpec((9 * Cb, Cb), lambda n: (0, 0)),
                  pl.BlockSpec((1, Cb), lambda n: (0, 0))],
        out_specs=(pl.BlockSpec((1, Ho * Wo, Cb), lambda n: (n, 0, 0)),
                   pl.BlockSpec((1, 2, Cb), lambda n: (n, 0, 0))),
        scratch_shapes=[pltpu.VMEM((Ho + 2, (Wo + 2) * Cb), jnp.float32)],
        compiler_params=cparams,
    )(c1_rows, aff2w, w2, b2)
    aff3 = _affine_from_sums(jnp.sum(st3, axis=0), M, params["g3"], params["be3"])

    # ---- pass 4 ----
    out_rows = pl.pallas_call(
        functools.partial(_stage3_kernel, tile_r=tile_r, wo=Wo, cout=Cout),
        out_shape=jax.ShapeDtypeStruct((R, Wo * Cout), jnp.float32),
        grid=(g,),
        in_specs=[pl.BlockSpec((tile_m, Cb), lambda i: (i, 0)),
                  pl.BlockSpec((2, Cb), lambda i: (0, 0)),
                  pl.BlockSpec((Cb, Cout), lambda i: (0, 0)),
                  pl.BlockSpec((1, Cout), lambda i: (0, 0)),
                  pl.BlockSpec((tile_r, Wo * Cout), lambda i: (i, 0))],
        out_specs=pl.BlockSpec((tile_r, Wo * Cout), lambda i: (i, 0)),
        compiler_params=cparams,
    )(c2_img.reshape(M, Cb), aff3, w3, b3, sc_rows)
    return out_rows.reshape(N, Ho, Wo, Cout)


def pre_act_residual_unit(x_nchw, params, stride=1, tile_m_cap=512):
    """Thin NCHW adapter matching the PyTorch module layout.  Prefer the NHWC entry
    point inside an NHWC-native network (saves two full HBM transposes)."""
    x = jnp.transpose(x_nchw, (0, 2, 3, 1))
    out = pre_act_residual_unit_nhwc(x, params, stride=stride, tile_m_cap=tile_m_cap)
    return jnp.transpose(out, (0, 3, 1, 2))


# ----------------------------------------------------------------- pure-JAX reference
def reference_nhwc(x, params, stride=1):
    def bn_relu(h, gamma, beta):
        m = jnp.mean(h, axis=(0, 1, 2), keepdims=True)
        v = jnp.mean((h - m) ** 2, axis=(0, 1, 2), keepdims=True)
        y = (h - m) * jax.lax.rsqrt(v + EPS) * gamma.reshape(1, 1, 1, -1) \
            + beta.reshape(1, 1, 1, -1)
        return jnp.maximum(y, 0.0)

    x = x.astype(jnp.float32)
    a1 = bn_relu(x, params["g1"], params["be1"])
    a1s = a1[:, ::stride, ::stride, :]
    xs = x[:, ::stride, ::stride, :]
    c1 = jnp.einsum("nhwc,cd->nhwd", a1s, params["w1"]) + params["b1"].reshape(1, 1, 1, -1)
    a2 = bn_relu(c1, params["g2"], params["be2"])
    Ho, Wo = c1.shape[1], c1.shape[2]
    a2p = jnp.pad(a2, ((0, 0), (1, 1), (1, 1), (0, 0)))
    acc = 0.0
    for dy in range(3):
        for dx in range(3):
            acc = acc + jnp.einsum("nhwc,cd->nhwd",
                                   a2p[:, dy:dy + Ho, dx:dx + Wo, :], params["w2"][dy, dx])
    c2 = acc + params["b2"].reshape(1, 1, 1, -1)
    a3 = bn_relu(c2, params["g3"], params["be3"])
    c3 = jnp.einsum("nhwc,cd->nhwd", a3, params["w3"]) + params["b3"].reshape(1, 1, 1, -1)
    sc = jnp.einsum("nhwc,cd->nhwd", xs, params["wsc"]) + params["bsc"].reshape(1, 1, 1, -1)
    return c3 + sc


if __name__ == "__main__":
    # module-consistent small shapes: out_channels divisible by 4
    N, Cin, H, W = 2, 8, 16, 16
    Cout = 16
    Cb = Cout // 4

    key = jax.random.PRNGKey(0)
    ks = jax.random.split(key, 16)
    # A PyTorch Conv2d weight (Cout, Cin, kh, kw) maps to our (kh, kw, Cin, Cout)/(Cin, Cout)
    params = {
        "g1":  1.0 + 0.1 * jax.random.normal(ks[0], (1, Cin), jnp.float32),
        "be1": 0.1 * jax.random.normal(ks[1], (1, Cin), jnp.float32),
        "w1":  0.2 * jax.random.normal(ks[2], (Cin, Cb), jnp.float32),
        "b1":  0.1 * jax.random.normal(ks[3], (1, Cb), jnp.float32),
        "g2":  1.0 + 0.1 * jax.random.normal(ks[4], (1, Cb), jnp.float32),
        "be2": 0.1 * jax.random.normal(ks[5], (1, Cb), jnp.float32),
        "w2":  0.2 * jax.random.normal(ks[6], (3, 3, Cb, Cb), jnp.float32),
        "b2":  0.1 * jax.random.normal(ks[7], (1, Cb), jnp.float32),
        "g3":  1.0 + 0.1 * jax.random.normal(ks[8], (1, Cb), jnp.float32),
        "be3": 0.1 * jax.random.normal(ks[9], (1, Cb), jnp.float32),
        "w3":  0.2 * jax.random.normal(ks[10], (Cb, Cout), jnp.float32),
        "b3":  0.1 * jax.random.normal(ks[11], (1, Cout), jnp.float32),
        "wsc": 0.2 * jax.random.normal(ks[12], (Cin, Cout), jnp.float32),
        "bsc": 0.1 * jax.random.normal(ks[13], (1, Cout), jnp.float32),
    }
    x = jax.random.normal(ks[15], (N, H, W, Cin), jnp.float32)        # NHWC

    # stride=1 with a small tile cap exercises a 4-step grid; stride=2 uses the default.
    for stride, cap in ((1, 128), (2, 512)):
        out = jax.block_until_ready(
            pre_act_residual_unit_nhwc(x, params, stride=stride, tile_m_cap=cap))
        ref = reference_nhwc(x, params, stride=stride)
        assert out.shape == (N, H // stride, W // stride, Cout), out.shape
        max_err = float(jnp.max(jnp.abs(out - ref)))
        # bf16 MXU operands => compare against the f32 reference at bf16 tolerance
        assert max_err < 1e-1, f"stride={stride}: mismatch vs reference: {max_err}"

    print("KERNEL_OK")
</pallas_src>

<mosaic_0001>
module attributes {stable_mosaic.version = 11 : i64} {
  func.func @_stats_kernel(%arg0: i32, %arg1: memref<128x8xf32, #tpu.memory_space<vmem>>, %arg2: memref<1x2x8xf32, #tpu.memory_space<vmem>>) attributes {dimension_semantics = [#tpu.dimension_semantics<parallel>], iteration_bounds = array<i64: 4>, scalar_prefetch = 0 : i64, scratch_operands = 0 : i64, tpu.core_type = #tpu.core_type<tc>, window_params = [{transform_indices = @transform_0, window_bounds = array<i64: 128, 8>}, {transform_indices = @transform_1, window_bounds = array<i64: 1, 2, 8>}]} {
    %c0 = arith.constant 0 : index
    %c0_0 = arith.constant 0 : index
    %0 = vector.load %arg1[%c0, %c0_0] : memref<128x8xf32, #tpu.memory_space<vmem>>, vector<128x8xf32>
    %cst = arith.constant dense<0.000000e+00> : vector<8xf32>
    %1 = vector.multi_reduction <add>, %0, %cst [0] : vector<128x8xf32> to vector<8xf32>
    %2 = vector.shape_cast %1 : vector<8xf32> to vector<1x8xf32>
    %3 = arith.mulf %0, %0 : vector<128x8xf32>
    %cst_1 = arith.constant dense<0.000000e+00> : vector<8xf32>
    %4 = vector.multi_reduction <add>, %3, %cst_1 [0] : vector<128x8xf32> to vector<8xf32>
    %5 = vector.shape_cast %4 : vector<8xf32> to vector<1x8xf32>
    %6 = tpu.concatenate %2, %5 in 0 : vector<1x8xf32>, vector<1x8xf32> -> vector<2x8xf32>
    %7 = vector.shape_cast %6 : vector<2x8xf32> to vector<1x2x8xf32>
    %c0_2 = arith.constant 0 : index
    %c0_3 = arith.constant 0 : index
    %c0_4 = arith.constant 0 : index
    %8 = vector.load %arg2[%c0_2, %c0_3, %c0_4] : memref<1x2x8xf32, #tpu.memory_space<vmem>>, vector<1x2x8xf32>
    tpu.vector_store %arg2[%c0_2, %c0_3, %c0_4], %7 {strides = array<i32>} : memref<1x2x8xf32, #tpu.memory_space<vmem>>, vector<1x2x8xf32>,
    return
  }
  func.func @transform_0(%arg0: i32) -> (i32, i32) {
    %c0_i32 = arith.constant 0 : i32
    %c0_i32_0 = arith.constant 0 : i32
    return %arg0, %c0_i32 : i32, i32
  }
  func.func @transform_1(%arg0: i32) -> (i32, i32, i32) {
    %c0_i32 = arith.constant 0 : i32
    %c0_i32_0 = arith.constant 0 : i32
    %c0_i32_1 = arith.constant 0 : i32
    return %arg0, %c0_i32, %c0_i32_0 : i32, i32, i32
  }
}

</mosaic_0001>

<bundles_post_ra>
// kernel: tpu_custom_call.1
= control target key start
LH: loop header
LB: loop body
LE: loop exit
PB: predicated region body
PF: predicated region fallthrough
CT: control target
= control target key end

     0   :  { %6 = vsyncpa [#allocation3], 0  ;;  %s575_s0 = inlined_call_operand.vmem [shape: f32[512,8], index: 0, kind: input, shape index: {}]   ;;  %s576_s1 = inlined_call_operand.hbm [shape: f32[4,2,8], index: 1, kind: output, shape index: {}]  }
   0x1   :  { %8 = vsyncpa [#allocation3 + $0x1], 0  ;;  %s426_s6 = smov 0   ;;  %s428_s7 = smov 0  }
   0x2   :  { %s430_s8 = smov 0   ;;  %s432_s9 = smov 0  }
   0x3 LB: > { %s447_s10 = sadd.s32 4294967295, %s413_s9   ;;  %s301_s11 = sadd.s32 4294967294, %s413_s9   ;;  %s413_s9 = sphi %s432_s9, %s582_s9   ;;  %s409_s8 = sphi %s430_s8, %s581_s8   ;;  %s405_s7 = sphi %s428_s7, %s580_s7   ;;  %s401_s6 = sphi %s426_s6, %s579_s6  }
   0x4   : > { %s451_s12 = sadd.s32 1, %s413_s9   ;;  %s47_s13 = sadd.s32 1, %s409_s8 }
   0x5   : > { %s44_s14 = ssub.s32 %s413_s9, %s451_s12  ;;  %p57_p0 = scmp.ne.s32.totalorder %s409_s8, %s405_s7 }
   0x6   : > { %p45_p1 = scmp.eq.s32.totalorder %s44_s14, 0  ;;  %p58_p2 = scmp.eq.s32.totalorder %s447_s10, 3 }
   0x7   : > { %p63_p3 = scmp.ne.s32.totalorder %s405_s7, %s401_s6  ;;  %p64_p4 = scmp.eq.s32.totalorder %s301_s11, 3 }
   0x8   : > { %s462_s15 = scalar_select %p45_p1, %s409_s8, %s47_s13  }
   0x9   : > { %p464_p5 = por %p58_p2, %p57_p0  ;;  %p468_p6 = por %p64_p4, %p63_p3 }
   0xa   : > { %p304_p7 = scmp.ge.s32.totalorder %s413_s9, 1  ;;  %p91_p8 = scmp.lt.s32.totalorder %s413_s9, 5 }
   0xc   : > { %p92_p9 = pnand %p304_p7, %p91_p8 }
   0xd   : > { %s306_s18 = sshll.u32 (!%p92_p9), %s447_s10, 4  ;;  %vm133_vm0 = vcmask (!%p92_p9), 64512   ;;  %s108_s23 = sand.u32 (!%p92_p9), 1, %s405_s7   ;;  %vm224_vm1 = vcmask (!%p92_p9), 1040384   ;;  %vm226_vm2 = vcmask (!%p92_p9), 58368  }
   0xe   : > { %95 = sbr.rel (%p92_p9) target bundleno = 86 (0x56), region = 24  ;;  %p112_p10 = scmp.lt.s32.totalorder (!%p92_p9), %s306_s18, 63 }
   0xf   : > { %s305_s24 = sshll.u32 (!%p92_p9), %s108_s23, 1  ;;  %s309_s27 = sshll.u32 (!%p92_p9), %s447_s10, 5 }
  0x10   : > { %s110_s25 = scalar_lea.vmem (!%p92_p9), [#allocation2], %s305_s24  ;;  %s535_s30 = scalar_lea.hbm (!%p92_p9), %s576_s1, %s309_s27 }
  0x11   : > { %s242_s26 = sshll.u32 (!%p92_p9), %s110_s25, 4  ;;  %s229_s2 = scalar_lea.sflag (!%p92_p9), [#allocation3], %s108_s23  ;;  %s530_s26 = int_to_ptr.vmem [resolvable:$true] %s242_s26 }
  0x12   : > { %s351_s3 = scalar_lea.vmem (!%p92_p9), %s530_s26, 32  ;;  %s415_s4 = smov (!%p92_p9), [#allocation2]  }
  0x13   : > { %p352_p11 = scmp.ne.s32.totalorder (!%p92_p9), %s530_s26, %s351_s3  ;;  %s355_s5 = sshll.u32 (!%p92_p9), %s415_s4, 4  ;;  %s356_s5 = int_to_ptr.vmem [resolvable:$false] %s355_s5 }
  0x14   : > { %s357_s10 = scalar_lea.vmem (!%p92_p9), %s356_s5, 64  ;;  %p358_p0 = scmp.lt.s32.totalorder (!%p92_p9), %s530_s26, %s356_s5 }
  0x15   : > { %s584_s18 = smov (!%p112_p10, %s306_s18), 63  ;;  %p353_p12 = pnand %p352_p11, %p464_p5 }
  0x16   : > { %s307_s19 = sshll.u32 %s584_s18, 3  ;;  %p359_p1 = scmp.lt.s32.totalorder %s357_s10, %s351_s3 }
  0x17   : > { %s478_s22 = scalar_lea.vmem %s575_s0, %s307_s19  ;;  %p354_p13 = pneg %p353_p12 }
  0x18   : > { %v117_v0 = vld [vmem:[%s478_s22] sm:$0xff]  ;;  %v118_v1 = vld [vmem:[%s478_s22 + $0x8] sm:$0xff]  ;;  %v119_v2 = vld [vmem:[%s478_s22 + $0x10] sm:$0xff]  ;;  %p360_p2 = por %p359_p1, %p358_p0 }
  0x19   : > { %v134_v3 = vsel %vm133_vm0, %v117_v0, 0.0  ;;  %v135_v4 = vsel %vm133_vm0, %v118_v1, 0.0  ;;  %v137_v5 = vsel %vm133_vm0, %v119_v2, 0.0  ;;  %v120_v6 = vld [vmem:[%s478_s22 + $0x18] sm:$0xff]  ;;  %v121_v9 = vld [vmem:[%s478_s22 + $0x20] sm:$0xff]  ;;  %v122_v12 = vld [vmem:[%s478_s22 + $0x28] sm:$0xff]  ;;  %v171_v14 = vmul.f32 %v117_v0, %v117_v0 }
  0x1a   : > { %v136_v7 = vadd.f32 %v135_v4, %v134_v3  ;;  %v139_v8 = vsel %vm133_vm0, %v120_v6, 0.0  ;;  %v141_v11 = vsel %vm133_vm0, %v121_v9, 0.0  ;;  %v172_v15 = vmul.f32 %v118_v1, %v118_v1  ;;  %v123_v18 = vld [vmem:[%s478_s22 + $0x30] sm:$0xff]  ;;  %v124_v23 = vld [vmem:[%s478_s22 + $0x38] sm:$0xff]  ;;  %v125_v30 = vld [vmem:[%s478_s22 + $0x40] sm:$0xff]  ;;  %p361_p3 = pnand %p360_p2, %p354_p13 }
  0x1b   : > { %v173_v16 = vmul.f32 %v119_v2, %v119_v2  ;;  %v143_v17 = vsel %vm133_vm0, %v122_v12, 0.0  ;;  %v174_v20 = vmul.f32 %v120_v6, %v120_v6  ;;  %v145_v21 = vsel %vm133_vm0, %v123_v18, 0.0  ;;  %v126_v36 = vld [vmem:[%s478_s22 + $0x48] sm:$0xff]  ;;  %v127_v42 = vld [vmem:[%s478_s22 + $0x50] sm:$0xff]  ;;  %v128_v48 = vld [vmem:[%s478_s22 + $0x58] sm:$0xff] }
  0x1c   : > { %v138_v10 = vadd.f32 %v137_v5, %v136_v7  ;;  %v175_v22 = vmul.f32 %v121_v9, %v121_v9  ;;  %v187_v25 = vsel %vm133_vm0, %v171_v14, 0.0  ;;  %v188_v26 = vsel %vm133_vm0, %v172_v15, 0.0  ;;  %v129_v54 = vld [vmem:[%s478_s22 + $0x60] sm:$0xff]  ;;  %v130_v60 = vld [vmem:[%s478_s22 + $0x68] sm:$0xff]  ;;  %v131_v2 = vld [vmem:[%s478_s22 + $0x70] sm:$0xff] }
  0x1d   : > { %v190_v27 = vsel %vm133_vm0, %v173_v16, 0.0  ;;  %v147_v28 = vsel %vm133_vm0, %v124_v23, 0.0  ;;  %v189_v29 = vadd.f32 %v188_v26, %v187_v25  ;;  %v176_v32 = vmul.f32 %v122_v12, %v122_v12 }
  0x1e   : > { %v140_v13 = vadd.f32 %v139_v8, %v138_v10  ;;  %v192_v33 = vsel %vm133_vm0, %v174_v20, 0.0  ;;  %v149_v34 = vsel %vm133_vm0, %v125_v30, 0.0  ;;  %v177_v38 = vmul.f32 %v123_v18, %v123_v18  ;;  %v132_v8 = vld [vmem:[%s478_s22 + $0x78] sm:$0xff] }
  0x1f   : > { %v191_v35 = vadd.f32 %v190_v27, %v189_v29  ;;  %v194_v39 = vsel %vm133_vm0, %v175_v22, 0.0  ;;  %v151_v40 = vsel %vm133_vm0, %v126_v36, 0.0  ;;  %v178_v44 = vmul.f32 %v124_v23, %v124_v23 }
  0x20   : > { %v142_v19 = vadd.f32 %v141_v11, %v140_v13  ;;  %v196_v45 = vsel %vm133_vm0, %v176_v32, 0.0  ;;  %v153_v46 = vsel %vm133_vm0, %v127_v42, 0.0  ;;  %v179_v50 = vmul.f32 %v125_v30, %v125_v30 }
  0x21   : > { %v193_v41 = vadd.f32 %v192_v33, %v191_v35  ;;  %v198_v51 = vsel %vm133_vm0, %v177_v38, 0.0  ;;  %v155_v52 = vsel %vm133_vm0, %v128_v48, 0.0  ;;  %v180_v56 = vmul.f32 %v126_v36, %v126_v36 }
  0x22   : > { %v144_v24 = vadd.f32 %v143_v17, %v142_v19  ;;  %v200_v57 = vsel %vm133_vm0, %v178_v44, 0.0  ;;  %v157_v58 = vsel %vm133_vm0, %v129_v54, 0.0  ;;  %v181_v62 = vmul.f32 %v127_v42, %v127_v42 }
  0x23   : > { %v195_v47 = vadd.f32 %v194_v39, %v193_v41  ;;  %v202_v63 = vsel %vm133_vm0, %v179_v50, 0.0  ;;  %v159_v0 = vsel %vm133_vm0, %v130_v60, 0.0  ;;  %v182_v4 = vmul.f32 %v128_v48, %v128_v48 }
  0x24   : > { %v146_v31 = vadd.f32 %v145_v21, %v144_v24  ;;  %v204_v5 = vsel %vm133_vm0, %v180_v56, 0.0  ;;  %v161_v6 = vsel %vm133_vm0, %v131_v2, 0.0  ;;  %v183_v10 = vmul.f32 %v129_v54, %v129_v54 }
  0x25   : > { %v197_v53 = vadd.f32 %v196_v45, %v195_v47  ;;  %v206_v11 = vsel %vm133_vm0, %v181_v62, 0.0  ;;  %v163_v12 = vsel %vm133_vm0, %v132_v8, 0.0  ;;  %v184_v15 = vmul.f32 %v130_v60, %v130_v60 }
  0x26   : > { %v148_v37 = vadd.f32 %v147_v28, %v146_v31  ;;  %v208_v16 = vsel %vm133_vm0, %v182_v4, 0.0  ;;  %v185_v19 = vmul.f32 %v131_v2, %v131_v2  ;;  %v210_v20 = vsel %vm133_vm0, %v183_v10, 0.0 }
  0x27   : > { %v199_v59 = vadd.f32 %v198_v51, %v197_v53  ;;  %v186_v23 = vmul.f32 %v132_v8, %v132_v8  ;;  %v212_v24 = vsel %vm133_vm0, %v184_v15, 0.0 }
  0x28   : > { %v150_v43 = vadd.f32 %v149_v34, %v148_v37  ;;  %v214_v27 = vsel %vm133_vm0, %v185_v19, 0.0 }
  0x29   : > { %v201_v1 = vadd.f32 %v200_v57, %v199_v59  ;;  %v216_v29 = vsel %vm133_vm0, %v186_v23, 0.0 }
  0x2a   : > { %v152_v49 = vadd.f32 %v151_v40, %v150_v43 }
  0x2b   : > { %v203_v7 = vadd.f32 %v202_v63, %v201_v1 }
  0x2c   : > { %v154_v55 = vadd.f32 %v153_v46, %v152_v49 }
  0x2d   : > { %v205_v13 = vadd.f32 %v204_v5, %v203_v7 }
  0x2e   : > { %v156_v61 = vadd.f32 %v155_v52, %v154_v55 }
  0x2f   : > { %v207_v17 = vadd.f32 %v206_v11, %v205_v13 }
  0x30   : > { %v158_v3 = vadd.f32 %v157_v58, %v156_v61 }
  0x31   : > { %v209_v21 = vadd.f32 %v208_v16, %v207_v17 }
  0x32   : > { %v160_v9 = vadd.f32 %v159_v0, %v158_v3 }
  0x33   : > { %v211_v25 = vadd.f32 %v210_v20, %v209_v21 }
  0x34   : > { %v162_v14 = vadd.f32 %v161_v6, %v160_v9 }
  0x35   : > { %v213_v28 = vadd.f32 %v212_v24, %v211_v25 }
  0x36   : > { %v164_v18 = vadd.f32 %v163_v12, %v162_v14 }
  0x37   : > { %v215_v31 = vadd.f32 %v214_v27, %v213_v28 }
  0x38   : > { %v165_v22 = vrot.slane %v164_v18, 4 }
  0x39   : > { %v217_v32 = vadd.f32 %v216_v29, %v215_v31 }
  0x3a   : > { %v166_v26 = vadd.f32 %v165_v22, %v164_v18 }
  0x3b   : > { %v218_v34 = vrot.slane %v217_v32, 4 }
  0x3c   : > { %v167_v30 = vrot.slane %v166_v26, 2 }
  0x3d   : > { %v219_v35 = vadd.f32 %v218_v34, %v217_v32 }
  0x3e   : > { %v168_v33 = vadd.f32 %v167_v30, %v166_v26 }
  0x3f   : > { %v220_v37 = vrot.slane %v219_v35, 2 }
  0x40   : > { %v169_v36 = vrot.slane %v168_v33, 1 }
  0x41   : > { %v221_v38 = vadd.f32 %v220_v37, %v219_v35 }
  0x42   : > { %v170_v39 = vadd.f32 %v169_v36, %v168_v33 }
  0x43   : > { %v222_v40 = vrot.slane %v221_v38, 1 }
  0x45   : > { %v223_v41 = vadd.f32 %v222_v40, %v221_v38 }
  0x47   : > { %v225_v42 = vsel %vm224_vm1, %v170_v39, %v223_v41 }
  0x48   : > { %227 = vst.msk [vmem:[%s110_s25] sm:$0x3] %vm226_vm2, %v225_v42 }
  0x49   : > { %364 = shalt.err (!%p361_p3)
}
  0x4a   : > { %s365_s11 = scalar_lea.hbm %s535_s30, 32  ;;  %s369_s18 = scalar_lea.hbm %s576_s1, 128 }
  0x4b   : > { %p366_p4 = scmp.ne.s32.totalorder %s535_s30, %s365_s11  ;;  %p370_p9 = scmp.lt.u32.totalorder %s535_s30, %s576_s1 }
  0x4c   : > { %p371_p10 = scmp.lt.u32.totalorder %s369_s18, %s365_s11  ;;  %p373_p12 = scmp.lt.u32.totalorder %s365_s11, %s535_s30 }
  0x4d   : > { %p367_p7 = pnand %p366_p4, %p464_p5 }
  0x4e   : > { %p372_p11 = por %p371_p10, %p370_p9 }
  0x4f   : > { %p368_p8 = pneg %p367_p7 }
  0x50   : > { %p374_p13 = por %p373_p12, %p372_p11 }
  0x52   : > { %p375_p0 = pnand %p374_p13, %p368_p8 }
  0x54   : > { %378 = shalt.err (!%p375_p0)
}
  0x55   : > { %312 = dma.vmem_to_hbm [thread:$0]  (%p464_p5), %s530_s26, 32, %s535_s30, %s229_s2  }
  0x56 PF: > { %p318_p1 = scmp.ge.s32.totalorder %s413_s9, 2  ;;  %s254_s21 = sand.u32 1, %s401_s6  }
  0x57   : > { %s255_s22 = scalar_lea.sflag [#allocation3], %s254_s21 }
  0x58   : > { %p315_p2 = pnand %p318_p1, %p468_p6 }
  0x5a   : > { %396 = dma.done.wait (!%p315_p2), %s255_s22, 32  }
  0x5b   : > { %398 = vsyncadd (!%p315_p2), %s255_s22, 4294967264  ;;  %p11_p3 = scmp.ge.s32.totalorder %s451_s12, 6   ;;  %s579_s6 = smov %s405_s7 }
  0x5c   : > { %s580_s7 = smov %s409_s8  ;;  %s581_s8 = smov %s462_s15 }
  0x5d   : > { %s582_s9 = smov %s451_s12  ;;  %13 = sbr.rel (!%p11_p3) target bundleno = 3 (0x3), region = 59 }
  0x64   :  { %260 = vsyncpa [#allocation3], 1 }
  0x65   :  { %262 = vsyncpa [#allocation3 + $0x1], 1 }

</bundles_post_ra>
